<compile_context>
chip_gen: v7x
topology: tpu7x:2x2x1
jax: 0.10.0
libtpu: 0.0.40
codegen_flags: <defaults>
</compile_context>

<pallas_src>
import jax
import jax.numpy as jnp
from jax.experimental import pallas as pl
from jax.experimental.pallas import tpu as pltpu

LANE = 128          # lane width of a vreg
SUB = 8             # sublane count of a vreg
GRANULE_ROWS = SUB  # minimum row-tile (8 sublanes x 128 lanes = 1024 batch elems)


def agent_mlp_kernel(params_ref, x_ref, o_ref):
    """One batch tile of the 2-layer MLP.

    params_ref : SMEM (rows, s_size + a_size + 2) f32 packed table:
                   cols [0:s)      -> w1.T   (rows j, cols s)
                   col  s          -> b1
                   cols [s+1:s+1+a)-> w2
                   col  s+1+a      -> b2 (first a rows; rest 0)
                 rows beyond h_size (if any) are zero => contribute nothing.
    x_ref      : VMEM (s_size, R, 128)   batch folded into (sublane, lane)
    o_ref      : VMEM (a_size, R, 128)
    """
    rows = params_ref.shape[0]
    s_size = x_ref.shape[0]
    a_size = o_ref.shape[0]
    c_b1 = s_size
    c_w2 = s_size + 1
    c_b2 = s_size + 1 + a_size

    # Load the s_size input slabs once; everything below is pure VPU/EUP work.
    xs = [x_ref[s] for s in range(s_size)]

    accs = [None] * a_size
    for j in range(rows):                       # h_size = 16, fully unrolled
        hj = xs[0] * params_ref[j, 0]
        for s in range(1, s_size):              # s_size = 2 -> 1 extra FMA
            hj = hj + xs[s] * params_ref[j, s]
        hj = jnp.maximum(hj + params_ref[j, c_b1], 0.0)
        for a in range(a_size):                 # a_size = 1
            term = hj * params_ref[j, c_w2 + a]
            accs[a] = term if accs[a] is None else accs[a] + term

    for a in range(a_size):
        o_ref[a] = jnp.tanh(accs[a] + params_ref[a, c_b2]).astype(o_ref.dtype)


def pack_params(w1, b1, w2, b2):
    """Pack fc1/fc2 weights+biases into a single small f32 table for SMEM."""
    s_size, h_size = w1.shape
    a_size = w2.shape[1]
    rows = max(h_size, a_size)                  # zero rows are mathematically inert
    cols = s_size + 1 + a_size + 1
    p = jnp.zeros((rows, cols), jnp.float32)
    p = p.at[:h_size, :s_size].set(w1.T.astype(jnp.float32))
    p = p.at[:h_size, s_size].set(b1.astype(jnp.float32))
    p = p.at[:h_size, s_size + 1:s_size + 1 + a_size].set(w2.astype(jnp.float32))
    p = p.at[:a_size, s_size + 1 + a_size].set(b2.astype(jnp.float32))
    return p


def agent_forward_folded(x_folded, params, *, block_b=256 * 1024):
    """Run the MLP on x already in the kernel layout.

    x_folded : (s_size, n_rows, 128) f32  -- batch folded into (sublane, lane)
    params   : output of pack_params
    Returns (a_size, n_rows, 128) f32.
    """
    s_size, n_rows, lane = x_folded.shape
    assert lane == LANE, "last axis of the folded input must be 128 lanes"
    rows_p, cols = params.shape
    a_size = cols - (s_size + 2)

    # Row tiling: units of 8-sublane granules (= 1024 batch elements).
    cap_g = max(1, (block_b // LANE) // GRANULE_ROWS)      # cap from block_b
    g_total = pl.cdiv(n_rows, GRANULE_ROWS)
    # Keep the grid >= 2 steps whenever possible so "parallel" can shard the
    # batch axis across v7x's two TensorCores.
    tb_g = max(1, min(cap_g, g_total // 2))
    g_padded = pl.cdiv(g_total, tb_g) * tb_g
    r_tile = tb_g * GRANULE_ROWS
    n_rows_pad = g_padded * GRANULE_ROWS
    if n_rows_pad != n_rows:
        x_folded = jnp.pad(x_folded, ((0, 0), (0, n_rows_pad - n_rows), (0, 0)))
    grid = (n_rows_pad // r_tile,)

    out = pl.pallas_call(
        agent_mlp_kernel,
        out_shape=jax.ShapeDtypeStruct((a_size, n_rows_pad, LANE), jnp.float32),
        grid_spec=pltpu.PrefetchScalarGridSpec(
            num_scalar_prefetch=0,
            grid=grid,
            in_specs=[
                # One small packed weight table, resident in SMEM (no per-step DMA).
                pl.BlockSpec(memory_space=pltpu.MemorySpace.SMEM),
                # Dense (8,128)-aligned batch slab.
                pl.BlockSpec((s_size, r_tile, LANE), lambda i: (0, i, 0)),
            ],
            out_specs=pl.BlockSpec((a_size, r_tile, LANE), lambda i: (0, i, 0)),
        ),
        compiler_params=pltpu.CompilerParams(
            dimension_semantics=("parallel",),          # shard batch tiles over TCs
            vmem_limit_bytes=32 * 1024 * 1024,          # safe headroom on v5e/v6e/v7x
        ),
    )(params, x_folded)

    return out[:, :n_rows, :]


def agent_forward(x, w1, b1, w2, b2, *, block_b=256 * 1024):
    """Forward pass of Agent with the PyTorch-style (B, s_size) interface.

    x : (B, s_size) f32
    w1: (s_size, h_size), b1: (h_size,)   -- y1 = relu(x @ w1 + b1)
    w2: (h_size, a_size), b2: (a_size,)   -- y  = tanh(y1 @ w2 + b2)
    Returns (B, a_size) f32.
    """
    B, s_size = x.shape
    a_size = w2.shape[1]
    params = pack_params(w1, b1, w2, b2)

    B_pad = pl.cdiv(B, LANE) * LANE
    n_rows = B_pad // LANE
    # Single pad+transpose pass to reach the folded layout.
    # TODO(synk): rollout buffers can be written directly in the folded
    # (s_size, n_rows, 128) layout and passed to agent_forward_folded to skip
    # this transpose entirely.
    xt = jnp.pad(x, ((0, B_pad - B), (0, 0))).T.reshape(s_size, n_rows, LANE)

    out_folded = agent_forward_folded(xt, params, block_b=block_b)
    out_flat = out_folded.reshape(a_size, n_rows * LANE)[:, :B]
    if a_size == 1:
        return out_flat.reshape(B, 1)        # pure reshape, no transpose pass
    return out_flat.T


def init_params(key, s_size, h_size, a_size):
    """Deterministic PyTorch-Linear-style init: U(-1/sqrt(fan_in), 1/sqrt(fan_in))."""
    k1, k2, k3, k4 = jax.random.split(key, 4)
    bound1 = 1.0 / jnp.sqrt(s_size)
    bound2 = 1.0 / jnp.sqrt(h_size)
    w1 = jax.random.uniform(k1, (s_size, h_size), jnp.float32, -bound1, bound1)
    b1 = jax.random.uniform(k2, (h_size,), jnp.float32, -bound1, bound1)
    w2 = jax.random.uniform(k3, (h_size, a_size), jnp.float32, -bound2, bound2)
    b2 = jax.random.uniform(k4, (a_size,), jnp.float32, -bound2, bound2)
    return w1, b1, w2, b2


if __name__ == "__main__":
    # TODO(synk): Agent.evaluate()'s gym env reset/step rollout loop (and the
    # .cpu().data transfer in forward) have no Pallas equivalent; only the nn
    # forward pass is implemented here.
    s_size, h_size, a_size = 2, 16, 1   # MountainCarContinuous-v0 dims

    key = jax.random.PRNGKey(0)
    kx, kx2, kp = jax.random.split(key, 3)
    w1, b1, w2, b2 = init_params(kp, s_size, h_size, a_size)

    def ref_fn(xv):
        return jnp.tanh(jnp.maximum(xv @ w1 + b1, 0.0) @ w2 + b2)

    # Small RL-style batch (single grid step).
    batch = 8
    x = jax.random.normal(kx, (batch, s_size), jnp.float32)
    out = jax.block_until_ready(agent_forward(x, w1, b1, w2, b2))
    assert out.shape == (batch, a_size)
    assert jnp.allclose(out, ref_fn(x), atol=1e-5, rtol=1e-5)

    # Larger batch exercising row padding + multi-step grid (v7x dual-TC path).
    batch2 = 2500
    x2 = jax.random.normal(kx2, (batch2, s_size), jnp.float32)
    out2 = jax.block_until_ready(agent_forward(x2, w1, b1, w2, b2))
    assert out2.shape == (batch2, a_size)
    assert jnp.allclose(out2, ref_fn(x2), atol=1e-5, rtol=1e-5)

    print("KERNEL_OK")
</pallas_src>

<mosaic_0001>
module attributes {stable_mosaic.version = 11 : i64} {
  func.func @agent_mlp_kernel(%arg0: i32, %arg1: memref<16x5xf32, #tpu.memory_space<smem>>, %arg2: memref<2x8x128xf32, #tpu.memory_space<vmem>>, %arg3: memref<1x8x128xf32, #tpu.memory_space<vmem>>) attributes {dimension_semantics = [#tpu.dimension_semantics<parallel>], iteration_bounds = array<i64: 1>, scalar_prefetch = 0 : i64, scratch_operands = 0 : i64, tpu.core_type = #tpu.core_type<tc>, window_params = [{transform_indices = @transform_0, window_bounds = array<i64: 16, 5>}, {transform_indices = @transform_1, window_bounds = array<i64: 2, 8, 128>}, {transform_indices = @transform_2, window_bounds = array<i64: 1, 8, 128>}]} {
    %c0 = arith.constant 0 : index
    %c0_0 = arith.constant 0 : index
    %c0_1 = arith.constant 0 : index
    %0 = vector.load %arg2[%c0, %c0_0, %c0_1] : memref<2x8x128xf32, #tpu.memory_space<vmem>>, vector<1x8x128xf32>
    %1 = vector.shape_cast %0 : vector<1x8x128xf32> to vector<8x128xf32>
    %c1 = arith.constant 1 : index
    %c0_2 = arith.constant 0 : index
    %c0_3 = arith.constant 0 : index
    %2 = vector.load %arg2[%c1, %c0_2, %c0_3] : memref<2x8x128xf32, #tpu.memory_space<vmem>>, vector<1x8x128xf32>
    %3 = vector.shape_cast %2 : vector<1x8x128xf32> to vector<8x128xf32>
    %c0_4 = arith.constant 0 : index
    %c0_5 = arith.constant 0 : index
    %4 = memref.load %arg1[%c0_4, %c0_5] : memref<16x5xf32, #tpu.memory_space<smem>>
    %5 = vector.broadcast %4 : f32 to vector<8x128xf32>
    %6 = arith.mulf %1, %5 : vector<8x128xf32>
    %c0_6 = arith.constant 0 : index
    %c1_7 = arith.constant 1 : index
    %7 = memref.load %arg1[%c0_6, %c1_7] : memref<16x5xf32, #tpu.memory_space<smem>>
    %8 = vector.broadcast %7 : f32 to vector<8x128xf32>
    %9 = arith.mulf %3, %8 : vector<8x128xf32>
    %10 = arith.addf %6, %9 : vector<8x128xf32>
    %c0_8 = arith.constant 0 : index
    %c2 = arith.constant 2 : index
    %11 = memref.load %arg1[%c0_8, %c2] : memref<16x5xf32, #tpu.memory_space<smem>>
    %12 = vector.broadcast %11 : f32 to vector<8x128xf32>
    %13 = arith.addf %10, %12 : vector<8x128xf32>
    %cst = arith.constant 0.000000e+00 : f32
    %14 = vector.broadcast %cst : f32 to vector<8x128xf32>
    %15 = arith.maximumf %13, %14 : vector<8x128xf32>
    %c0_9 = arith.constant 0 : index
    %c3 = arith.constant 3 : index
    %16 = memref.load %arg1[%c0_9, %c3] : memref<16x5xf32, #tpu.memory_space<smem>>
    %17 = vector.broadcast %16 : f32 to vector<8x128xf32>
    %18 = arith.mulf %15, %17 : vector<8x128xf32>
    %c1_10 = arith.constant 1 : index
    %c0_11 = arith.constant 0 : index
    %19 = memref.load %arg1[%c1_10, %c0_11] : memref<16x5xf32, #tpu.memory_space<smem>>
    %20 = vector.broadcast %19 : f32 to vector<8x128xf32>
    %21 = arith.mulf %1, %20 : vector<8x128xf32>
    %c1_12 = arith.constant 1 : index
    %c1_13 = arith.constant 1 : index
    %22 = memref.load %arg1[%c1_12, %c1_13] : memref<16x5xf32, #tpu.memory_space<smem>>
    %23 = vector.broadcast %22 : f32 to vector<8x128xf32>
    %24 = arith.mulf %3, %23 : vector<8x128xf32>
    %25 = arith.addf %21, %24 : vector<8x128xf32>
    %c1_14 = arith.constant 1 : index
    %c2_15 = arith.constant 2 : index
    %26 = memref.load %arg1[%c1_14, %c2_15] : memref<16x5xf32, #tpu.memory_space<smem>>
    %27 = vector.broadcast %26 : f32 to vector<8x128xf32>
    %28 = arith.addf %25, %27 : vector<8x128xf32>
    %cst_16 = arith.constant 0.000000e+00 : f32
    %29 = vector.broadcast %cst_16 : f32 to vector<8x128xf32>
    %30 = arith.maximumf %28, %29 : vector<8x128xf32>
    %c1_17 = arith.constant 1 : index
    %c3_18 = arith.constant 3 : index
    %31 = memref.load %arg1[%c1_17, %c3_18] : memref<16x5xf32, #tpu.memory_space<smem>>
    %32 = vector.broadcast %31 : f32 to vector<8x128xf32>
    %33 = arith.mulf %30, %32 : vector<8x128xf32>
    %34 = arith.addf %18, %33 : vector<8x128xf32>
    %c2_19 = arith.constant 2 : index
    %c0_20 = arith.constant 0 : index
    %35 = memref.load %arg1[%c2_19, %c0_20] : memref<16x5xf32, #tpu.memory_space<smem>>
    %36 = vector.broadcast %35 : f32 to vector<8x128xf32>
    %37 = arith.mulf %1, %36 : vector<8x128xf32>
    %c2_21 = arith.constant 2 : index
    %c1_22 = arith.constant 1 : index
    %38 = memref.load %arg1[%c2_21, %c1_22] : memref<16x5xf32, #tpu.memory_space<smem>>
    %39 = vector.broadcast %38 : f32 to vector<8x128xf32>
    %40 = arith.mulf %3, %39 : vector<8x128xf32>
    %41 = arith.addf %37, %40 : vector<8x128xf32>
    %c2_23 = arith.constant 2 : index
    %c2_24 = arith.constant 2 : index
    %42 = memref.load %arg1[%c2_23, %c2_24] : memref<16x5xf32, #tpu.memory_space<smem>>
    %43 = vector.broadcast %42 : f32 to vector<8x128xf32>
    %44 = arith.addf %41, %43 : vector<8x128xf32>
    %cst_25 = arith.constant 0.000000e+00 : f32
    %45 = vector.broadcast %cst_25 : f32 to vector<8x128xf32>
    %46 = arith.maximumf %44, %45 : vector<8x128xf32>
    %c2_26 = arith.constant 2 : index
    %c3_27 = arith.constant 3 : index
    %47 = memref.load %arg1[%c2_26, %c3_27] : memref<16x5xf32, #tpu.memory_space<smem>>
    %48 = vector.broadcast %47 : f32 to vector<8x128xf32>
    %49 = arith.mulf %46, %48 : vector<8x128xf32>
    %50 = arith.addf %34, %49 : vector<8x128xf32>
    %c3_28 = arith.constant 3 : index
    %c0_29 = arith.constant 0 : index
    %51 = memref.load %arg1[%c3_28, %c0_29] : memref<16x5xf32, #tpu.memory_space<smem>>
    %52 = vector.broadcast %51 : f32 to vector<8x128xf32>
    %53 = arith.mulf %1, %52 : vector<8x128xf32>
    %c3_30 = arith.constant 3 : index
    %c1_31 = arith.constant 1 : index
    %54 = memref.load %arg1[%c3_30, %c1_31] : memref<16x5xf32, #tpu.memory_space<smem>>
    %55 = vector.broadcast %54 : f32 to vector<8x128xf32>
    %56 = arith.mulf %3, %55 : vector<8x128xf32>
    %57 = arith.addf %53, %56 : vector<8x128xf32>
    %c3_32 = arith.constant 3 : index
    %c2_33 = arith.constant 2 : index
    %58 = memref.load %arg1[%c3_32, %c2_33] : memref<16x5xf32, #tpu.memory_space<smem>>
    %59 = vector.broadcast %58 : f32 to vector<8x128xf32>
    %60 = arith.addf %57, %59 : vector<8x128xf32>
    %cst_34 = arith.constant 0.000000e+00 : f32
    %61 = vector.broadcast %cst_34 : f32 to vector<8x128xf32>
    %62 = arith.maximumf %60, %61 : vector<8x128xf32>
    %c3_35 = arith.constant 3 : index
    %c3_36 = arith.constant 3 : index
    %63 = memref.load %arg1[%c3_35, %c3_36] : memref<16x5xf32, #tpu.memory_space<smem>>
    %64 = vector.broadcast %63 : f32 to vector<8x128xf32>
    %65 = arith.mulf %62, %64 : vector<8x128xf32>
    %66 = arith.addf %50, %65 : vector<8x128xf32>
    %c4 = arith.constant 4 : index
    %c0_37 = arith.constant 0 : index
    %67 = memref.load %arg1[%c4, %c0_37] : memref<16x5xf32, #tpu.memory_space<smem>>
    %68 = vector.broadcast %67 : f32 to vector<8x128xf32>
    %69 = arith.mulf %1, %68 : vector<8x128xf32>
    %c4_38 = arith.constant 4 : index
    %c1_39 = arith.constant 1 : index
    %70 = memref.load %arg1[%c4_38, %c1_39] : memref<16x5xf32, #tpu.memory_space<smem>>
    %71 = vector.broadcast %70 : f32 to vector<8x128xf32>
    %72 = arith.mulf %3, %71 : vector<8x128xf32>
    %73 = arith.addf %69, %72 : vector<8x128xf32>
    %c4_40 = arith.constant 4 : index
    %c2_41 = arith.constant 2 : index
    %74 = memref.load %arg1[%c4_40, %c2_41] : memref<16x5xf32, #tpu.memory_space<smem>>
    %75 = vector.broadcast %74 : f32 to vector<8x128xf32>
    %76 = arith.addf %73, %75 : vector<8x128xf32>
    %cst_42 = arith.constant 0.000000e+00 : f32
    %77 = vector.broadcast %cst_42 : f32 to vector<8x128xf32>
    %78 = arith.maximumf %76, %77 : vector<8x128xf32>
    %c4_43 = arith.constant 4 : index
    %c3_44 = arith.constant 3 : index
    %79 = memref.load %arg1[%c4_43, %c3_44] : memref<16x5xf32, #tpu.memory_space<smem>>
    %80 = vector.broadcast %79 : f32 to vector<8x128xf32>
    %81 = arith.mulf %78, %80 : vector<8x128xf32>
    %82 = arith.addf %66, %81 : vector<8x128xf32>
    %c5 = arith.constant 5 : index
    %c0_45 = arith.constant 0 : index
    %83 = memref.load %arg1[%c5, %c0_45] : memref<16x5xf32, #tpu.memory_space<smem>>
    %84 = vector.broadcast %83 : f32 to vector<8x128xf32>
    %85 = arith.mulf %1, %84 : vector<8x128xf32>
    %c5_46 = arith.constant 5 : index
    %c1_47 = arith.constant 1 : index
    %86 = memref.load %arg1[%c5_46, %c1_47] : memref<16x5xf32, #tpu.memory_space<smem>>
    %87 = vector.broadcast %86 : f32 to vector<8x128xf32>
    %88 = arith.mulf %3, %87 : vector<8x128xf32>
    %89 = arith.addf %85, %88 : vector<8x128xf32>
    %c5_48 = arith.constant 5 : index
    %c2_49 = arith.constant 2 : index
    %90 = memref.load %arg1[%c5_48, %c2_49] : memref<16x5xf32, #tpu.memory_space<smem>>
    %91 = vector.broadcast %90 : f32 to vector<8x128xf32>
    %92 = arith.addf %89, %91 : vector<8x128xf32>
    %cst_50 = arith.constant 0.000000e+00 : f32
    %93 = vector.broadcast %cst_50 : f32 to vector<8x128xf32>
    %94 = arith.maximumf %92, %93 : vector<8x128xf32>
    %c5_51 = arith.constant 5 : index
    %c3_52 = arith.constant 3 : index
    %95 = memref.load %arg1[%c5_51, %c3_52] : memref<16x5xf32, #tpu.memory_space<smem>>
    %96 = vector.broadcast %95 : f32 to vector<8x128xf32>
    %97 = arith.mulf %94, %96 : vector<8x128xf32>
    %98 = arith.addf %82, %97 : vector<8x128xf32>
    %c6 = arith.constant 6 : index
    %c0_53 = arith.constant 0 : index
    %99 = memref.load %arg1[%c6, %c0_53] : memref<16x5xf32, #tpu.memory_space<smem>>
    %100 = vector.broadcast %99 : f32 to vector<8x128xf32>
    %101 = arith.mulf %1, %100 : vector<8x128xf32>
    %c6_54 = arith.constant 6 : index
    %c1_55 = arith.constant 1 : index
    %102 = memref.load %arg1[%c6_54, %c1_55] : memref<16x5xf32, #tpu.memory_space<smem>>
    %103 = vector.broadcast %102 : f32 to vector<8x128xf32>
    %104 = arith.mulf %3, %103 : vector<8x128xf32>
    %105 = arith.addf %101, %104 : vector<8x128xf32>
    %c6_56 = arith.constant 6 : index
    %c2_57 = arith.constant 2 : index
    %106 = memref.load %arg1[%c6_56, %c2_57] : memref<16x5xf32, #tpu.memory_space<smem>>
    %107 = vector.broadcast %106 : f32 to vector<8x128xf32>
    %108 = arith.addf %105, %107 : vector<8x128xf32>
    %cst_58 = arith.constant 0.000000e+00 : f32
    %109 = vector.broadcast %cst_58 : f32 to vector<8x128xf32>
    %110 = arith.maximumf %108, %109 : vector<8x128xf32>
    %c6_59 = arith.constant 6 : index
    %c3_60 = arith.constant 3 : index
    %111 = memref.load %arg1[%c6_59, %c3_60] : memref<16x5xf32, #tpu.memory_space<smem>>
    %112 = vector.broadcast %111 : f32 to vector<8x128xf32>
    %113 = arith.mulf %110, %112 : vector<8x128xf32>
    %114 = arith.addf %98, %113 : vector<8x128xf32>
    %c7 = arith.constant 7 : index
    %c0_61 = arith.constant 0 : index
    %115 = memref.load %arg1[%c7, %c0_61] : memref<16x5xf32, #tpu.memory_space<smem>>
    %116 = vector.broadcast %115 : f32 to vector<8x128xf32>
    %117 = arith.mulf %1, %116 : vector<8x128xf32>
    %c7_62 = arith.constant 7 : index
    %c1_63 = arith.constant 1 : index
    %118 = memref.load %arg1[%c7_62, %c1_63] : memref<16x5xf32, #tpu.memory_space<smem>>
    %119 = vector.broadcast %118 : f32 to vector<8x128xf32>
    %120 = arith.mulf %3, %119 : vector<8x128xf32>
    %121 = arith.addf %117, %120 : vector<8x128xf32>
    %c7_64 = arith.constant 7 : index
    %c2_65 = arith.constant 2 : index
    %122 = memref.load %arg1[%c7_64, %c2_65] : memref<16x5xf32, #tpu.memory_space<smem>>
    %123 = vector.broadcast %122 : f32 to vector<8x128xf32>
    %124 = arith.addf %121, %123 : vector<8x128xf32>
    %cst_66 = arith.constant 0.000000e+00 : f32
    %125 = vector.broadcast %cst_66 : f32 to vector<8x128xf32>
    %126 = arith.maximumf %124, %125 : vector<8x128xf32>
    %c7_67 = arith.constant 7 : index
    %c3_68 = arith.constant 3 : index
    %127 = memref.load %arg1[%c7_67, %c3_68] : memref<16x5xf32, #tpu.memory_space<smem>>
    %128 = vector.broadcast %127 : f32 to vector<8x128xf32>
    %129 = arith.mulf %126, %128 : vector<8x128xf32>
    %130 = arith.addf %114, %129 : vector<8x128xf32>
    %c8 = arith.constant 8 : index
    %c0_69 = arith.constant 0 : index
    %131 = memref.load %arg1[%c8, %c0_69] : memref<16x5xf32, #tpu.memory_space<smem>>
    %132 = vector.broadcast %131 : f32 to vector<8x128xf32>
    %133 = arith.mulf %1, %132 : vector<8x128xf32>
    %c8_70 = arith.constant 8 : index
    %c1_71 = arith.constant 1 : index
    %134 = memref.load %arg1[%c8_70, %c1_71] : memref<16x5xf32, #tpu.memory_space<smem>>
    %135 = vector.broadcast %134 : f32 to vector<8x128xf32>
    %136 = arith.mulf %3, %135 : vector<8x128xf32>
    %137 = arith.addf %133, %136 : vector<8x128xf32>
    %c8_72 = arith.constant 8 : index
    %c2_73 = arith.constant 2 : index
    %138 = memref.load %arg1[%c8_72, %c2_73] : memref<16x5xf32, #tpu.memory_space<smem>>
    %139 = vector.broadcast %138 : f32 to vector<8x128xf32>
    %140 = arith.addf %137, %139 : vector<8x128xf32>
    %cst_74 = arith.constant 0.000000e+00 : f32
    %141 = vector.broadcast %cst_74 : f32 to vector<8x128xf32>
    %142 = arith.maximumf %140, %141 : vector<8x128xf32>
    %c8_75 = arith.constant 8 : index
    %c3_76 = arith.constant 3 : index
    %143 = memref.load %arg1[%c8_75, %c3_76] : memref<16x5xf32, #tpu.memory_space<smem>>
    %144 = vector.broadcast %143 : f32 to vector<8x128xf32>
    %145 = arith.mulf %142, %144 : vector<8x128xf32>
    %146 = arith.addf %130, %145 : vector<8x128xf32>
    %c9 = arith.constant 9 : index
    %c0_77 = arith.constant 0 : index
    %147 = memref.load %arg1[%c9, %c0_77] : memref<16x5xf32, #tpu.memory_space<smem>>
    %148 = vector.broadcast %147 : f32 to vector<8x128xf32>
    %149 = arith.mulf %1, %148 : vector<8x128xf32>
    %c9_78 = arith.constant 9 : index
    %c1_79 = arith.constant 1 : index
    %150 = memref.load %arg1[%c9_78, %c1_79] : memref<16x5xf32, #tpu.memory_space<smem>>
    %151 = vector.broadcast %150 : f32 to vector<8x128xf32>
    %152 = arith.mulf %3, %151 : vector<8x128xf32>
    %153 = arith.addf %149, %152 : vector<8x128xf32>
    %c9_80 = arith.constant 9 : index
    %c2_81 = arith.constant 2 : index
    %154 = memref.load %arg1[%c9_80, %c2_81] : memref<16x5xf32, #tpu.memory_space<smem>>
    %155 = vector.broadcast %154 : f32 to vector<8x128xf32>
    %156 = arith.addf %153, %155 : vector<8x128xf32>
    %cst_82 = arith.constant 0.000000e+00 : f32
    %157 = vector.broadcast %cst_82 : f32 to vector<8x128xf32>
    %158 = arith.maximumf %156, %157 : vector<8x128xf32>
    %c9_83 = arith.constant 9 : index
    %c3_84 = arith.constant 3 : index
    %159 = memref.load %arg1[%c9_83, %c3_84] : memref<16x5xf32, #tpu.memory_space<smem>>
    %160 = vector.broadcast %159 : f32 to vector<8x128xf32>
    %161 = arith.mulf %158, %160 : vector<8x128xf32>
    %162 = arith.addf %146, %161 : vector<8x128xf32>
    %c10 = arith.constant 10 : index
    %c0_85 = arith.constant 0 : index
    %163 = memref.load %arg1[%c10, %c0_85] : memref<16x5xf32, #tpu.memory_space<smem>>
    %164 = vector.broadcast %163 : f32 to vector<8x128xf32>
    %165 = arith.mulf %1, %164 : vector<8x128xf32>
    %c10_86 = arith.constant 10 : index
    %c1_87 = arith.constant 1 : index
    %166 = memref.load %arg1[%c10_86, %c1_87] : memref<16x5xf32, #tpu.memory_space<smem>>
    %167 = vector.broadcast %166 : f32 to vector<8x128xf32>
    %168 = arith.mulf %3, %167 : vector<8x128xf32>
    %169 = arith.addf %165, %168 : vector<8x128xf32>
    %c10_88 = arith.constant 10 : index
    %c2_89 = arith.constant 2 : index
    %170 = memref.load %arg1[%c10_88, %c2_89] : memref<16x5xf32, #tpu.memory_space<smem>>
    %171 = vector.broadcast %170 : f32 to vector<8x128xf32>
    %172 = arith.addf %169, %171 : vector<8x128xf32>
    %cst_90 = arith.constant 0.000000e+00 : f32
    %173 = vector.broadcast %cst_90 : f32 to vector<8x128xf32>
    %174 = arith.maximumf %172, %173 : vector<8x128xf32>
    %c10_91 = arith.constant 10 : index
    %c3_92 = arith.constant 3 : index
    %175 = memref.load %arg1[%c10_91, %c3_92] : memref<16x5xf32, #tpu.memory_space<smem>>
    %176 = vector.broadcast %175 : f32 to vector<8x128xf32>
    %177 = arith.mulf %174, %176 : vector<8x128xf32>
    %178 = arith.addf %162, %177 : vector<8x128xf32>
    %c11 = arith.constant 11 : index
    %c0_93 = arith.constant 0 : index
    %179 = memref.load %arg1[%c11, %c0_93] : memref<16x5xf32, #tpu.memory_space<smem>>
    %180 = vector.broadcast %179 : f32 to vector<8x128xf32>
    %181 = arith.mulf %1, %180 : vector<8x128xf32>
    %c11_94 = arith.constant 11 : index
    %c1_95 = arith.constant 1 : index
    %182 = memref.load %arg1[%c11_94, %c1_95] : memref<16x5xf32, #tpu.memory_space<smem>>
    %183 = vector.broadcast %182 : f32 to vector<8x128xf32>
    %184 = arith.mulf %3, %183 : vector<8x128xf32>
    %185 = arith.addf %181, %184 : vector<8x128xf32>
    %c11_96 = arith.constant 11 : index
    %c2_97 = arith.constant 2 : index
    %186 = memref.load %arg1[%c11_96, %c2_97] : memref<16x5xf32, #tpu.memory_space<smem>>
    %187 = vector.broadcast %186 : f32 to vector<8x128xf32>
    %188 = arith.addf %185, %187 : vector<8x128xf32>
    %cst_98 = arith.constant 0.000000e+00 : f32
    %189 = vector.broadcast %cst_98 : f32 to vector<8x128xf32>
    %190 = arith.maximumf %188, %189 : vector<8x128xf32>
    %c11_99 = arith.constant 11 : index
    %c3_100 = arith.constant 3 : index
    %191 = memref.load %arg1[%c11_99, %c3_100] : memref<16x5xf32, #tpu.memory_space<smem>>
    %192 = vector.broadcast %191 : f32 to vector<8x128xf32>
    %193 = arith.mulf %190, %192 : vector<8x128xf32>
    %194 = arith.addf %178, %193 : vector<8x128xf32>
    %c12 = arith.constant 12 : index
    %c0_101 = arith.constant 0 : index
    %195 = memref.load %arg1[%c12, %c0_101] : memref<16x5xf32, #tpu.memory_space<smem>>
    %196 = vector.broadcast %195 : f32 to vector<8x128xf32>
    %197 = arith.mulf %1, %196 : vector<8x128xf32>
    %c12_102 = arith.constant 12 : index
    %c1_103 = arith.constant 1 : index
    %198 = memref.load %arg1[%c12_102, %c1_103] : memref<16x5xf32, #tpu.memory_space<smem>>
    %199 = vector.broadcast %198 : f32 to vector<8x128xf32>
    %200 = arith.mulf %3, %199 : vector<8x128xf32>
    %201 = arith.addf %197, %200 : vector<8x128xf32>
    %c12_104 = arith.constant 12 : index
    %c2_105 = arith.constant 2 : index
    %202 = memref.load %arg1[%c12_104, %c2_105] : memref<16x5xf32, #tpu.memory_space<smem>>
    %203 = vector.broadcast %202 : f32 to vector<8x128xf32>
    %204 = arith.addf %201, %203 : vector<8x128xf32>
    %cst_106 = arith.constant 0.000000e+00 : f32
    %205 = vector.broadcast %cst_106 : f32 to vector<8x128xf32>
    %206 = arith.maximumf %204, %205 : vector<8x128xf32>
    %c12_107 = arith.constant 12 : index
    %c3_108 = arith.constant 3 : index
    %207 = memref.load %arg1[%c12_107, %c3_108] : memref<16x5xf32, #tpu.memory_space<smem>>
    %208 = vector.broadcast %207 : f32 to vector<8x128xf32>
    %209 = arith.mulf %206, %208 : vector<8x128xf32>
    %210 = arith.addf %194, %209 : vector<8x128xf32>
    %c13 = arith.constant 13 : index
    %c0_109 = arith.constant 0 : index
    %211 = memref.load %arg1[%c13, %c0_109] : memref<16x5xf32, #tpu.memory_space<smem>>
    %212 = vector.broadcast %211 : f32 to vector<8x128xf32>
    %213 = arith.mulf %1, %212 : vector<8x128xf32>
    %c13_110 = arith.constant 13 : index
    %c1_111 = arith.constant 1 : index
    %214 = memref.load %arg1[%c13_110, %c1_111] : memref<16x5xf32, #tpu.memory_space<smem>>
    %215 = vector.broadcast %214 : f32 to vector<8x128xf32>
    %216 = arith.mulf %3, %215 : vector<8x128xf32>
    %217 = arith.addf %213, %216 : vector<8x128xf32>
    %c13_112 = arith.constant 13 : index
    %c2_113 = arith.constant 2 : index
    %218 = memref.load %arg1[%c13_112, %c2_113] : memref<16x5xf32, #tpu.memory_space<smem>>
    %219 = vector.broadcast %218 : f32 to vector<8x128xf32>
    %220 = arith.addf %217, %219 : vector<8x128xf32>
    %cst_114 = arith.constant 0.000000e+00 : f32
    %221 = vector.broadcast %cst_114 : f32 to vector<8x128xf32>
    %222 = arith.maximumf %220, %221 : vector<8x128xf32>
    %c13_115 = arith.constant 13 : index
    %c3_116 = arith.constant 3 : index
    %223 = memref.load %arg1[%c13_115, %c3_116] : memref<16x5xf32, #tpu.memory_space<smem>>
    %224 = vector.broadcast %223 : f32 to vector<8x128xf32>
    %225 = arith.mulf %222, %224 : vector<8x128xf32>
    %226 = arith.addf %210, %225 : vector<8x128xf32>
    %c14 = arith.constant 14 : index
    %c0_117 = arith.constant 0 : index
    %227 = memref.load %arg1[%c14, %c0_117] : memref<16x5xf32, #tpu.memory_space<smem>>
    %228 = vector.broadcast %227 : f32 to vector<8x128xf32>
    %229 = arith.mulf %1, %228 : vector<8x128xf32>
    %c14_118 = arith.constant 14 : index
    %c1_119 = arith.constant 1 : index
    %230 = memref.load %arg1[%c14_118, %c1_119] : memref<16x5xf32, #tpu.memory_space<smem>>
    %231 = vector.broadcast %230 : f32 to vector<8x128xf32>
    %232 = arith.mulf %3, %231 : vector<8x128xf32>
    %233 = arith.addf %229, %232 : vector<8x128xf32>
    %c14_120 = arith.constant 14 : index
    %c2_121 = arith.constant 2 : index
    %234 = memref.load %arg1[%c14_120, %c2_121] : memref<16x5xf32, #tpu.memory_space<smem>>
    %235 = vector.broadcast %234 : f32 to vector<8x128xf32>
    %236 = arith.addf %233, %235 : vector<8x128xf32>
    %cst_122 = arith.constant 0.000000e+00 : f32
    %237 = vector.broadcast %cst_122 : f32 to vector<8x128xf32>
    %238 = arith.maximumf %236, %237 : vector<8x128xf32>
    %c14_123 = arith.constant 14 : index
    %c3_124 = arith.constant 3 : index
    %239 = memref.load %arg1[%c14_123, %c3_124] : memref<16x5xf32, #tpu.memory_space<smem>>
    %240 = vector.broadcast %239 : f32 to vector<8x128xf32>
    %241 = arith.mulf %238, %240 : vector<8x128xf32>
    %242 = arith.addf %226, %241 : vector<8x128xf32>
    %c15 = arith.constant 15 : index
    %c0_125 = arith.constant 0 : index
    %243 = memref.load %arg1[%c15, %c0_125] : memref<16x5xf32, #tpu.memory_space<smem>>
    %244 = vector.broadcast %243 : f32 to vector<8x128xf32>
    %245 = arith.mulf %1, %244 : vector<8x128xf32>
    %c15_126 = arith.constant 15 : index
    %c1_127 = arith.constant 1 : index
    %246 = memref.load %arg1[%c15_126, %c1_127] : memref<16x5xf32, #tpu.memory_space<smem>>
    %247 = vector.broadcast %246 : f32 to vector<8x128xf32>
    %248 = arith.mulf %3, %247 : vector<8x128xf32>
    %249 = arith.addf %245, %248 : vector<8x128xf32>
    %c15_128 = arith.constant 15 : index
    %c2_129 = arith.constant 2 : index
    %250 = memref.load %arg1[%c15_128, %c2_129] : memref<16x5xf32, #tpu.memory_space<smem>>
    %251 = vector.broadcast %250 : f32 to vector<8x128xf32>
    %252 = arith.addf %249, %251 : vector<8x128xf32>
    %cst_130 = arith.constant 0.000000e+00 : f32
    %253 = vector.broadcast %cst_130 : f32 to vector<8x128xf32>
    %254 = arith.maximumf %252, %253 : vector<8x128xf32>
    %c15_131 = arith.constant 15 : index
    %c3_132 = arith.constant 3 : index
    %255 = memref.load %arg1[%c15_131, %c3_132] : memref<16x5xf32, #tpu.memory_space<smem>>
    %256 = vector.broadcast %255 : f32 to vector<8x128xf32>
    %257 = arith.mulf %254, %256 : vector<8x128xf32>
    %258 = arith.addf %242, %257 : vector<8x128xf32>
    %c0_133 = arith.constant 0 : index
    %c4_134 = arith.constant 4 : index
    %259 = memref.load %arg1[%c0_133, %c4_134] : memref<16x5xf32, #tpu.memory_space<smem>>
    %260 = vector.broadcast %259 : f32 to vector<8x128xf32>
    %261 = arith.addf %258, %260 : vector<8x128xf32>
    %262 = math.tanh %261 : vector<8x128xf32>
    %c0_135 = arith.constant 0 : index
    %c0_136 = arith.constant 0 : index
    %c0_137 = arith.constant 0 : index
    %263 = vector.load %arg3[%c0_135, %c0_136, %c0_137] : memref<1x8x128xf32, #tpu.memory_space<vmem>>, vector<1x8x128xf32>
    %264 = vector.shape_cast %263 : vector<1x8x128xf32> to vector<8x128xf32>
    %265 = vector.shape_cast %262 : vector<8x128xf32> to vector<1x8x128xf32>
    tpu.vector_store %arg3[%c0_135, %c0_136, %c0_137], %265 {strides = array<i32>} : memref<1x8x128xf32, #tpu.memory_space<vmem>>, vector<1x8x128xf32>,
    return
  }
  func.func @transform_0(%arg0: i32) -> (i32, i32) {
    %c0_i32 = arith.constant 0 : i32
    %c0_i32_0 = arith.constant 0 : i32
    %c0_i32_1 = arith.constant 0 : i32
    return %c0_i32, %c0_i32_0 : i32, i32
  }
  func.func @transform_1(%arg0: i32) -> (i32, i32, i32) {
    %c0_i32 = arith.constant 0 : i32
    %c0_i32_0 = arith.constant 0 : i32
    %c0_i32_1 = arith.constant 0 : i32
    return %c0_i32, %arg0, %c0_i32_0 : i32, i32, i32
  }
  func.func @transform_2(%arg0: i32) -> (i32, i32, i32) {
    %c0_i32 = arith.constant 0 : i32
    %c0_i32_0 = arith.constant 0 : i32
    %c0_i32_1 = arith.constant 0 : i32
    return %c0_i32, %arg0, %c0_i32_0 : i32, i32, i32
  }
}

</mosaic_0001>

<bundles_post_ra>
// kernel: tpu_custom_call.1
= control target key start
LH: loop header
LB: loop body
LE: loop exit
PB: predicated region body
PF: predicated region fallthrough
CT: control target
= control target key end

     0   :  { %7 = vsyncpa [#allocation4], 0  ;;  %s645_s0 = inlined_call_operand.vmem [shape: f32[16,5], index: 0, kind: input, shape index: {}]   ;;  %s646_s1 = inlined_call_operand.vmem [shape: f32[2,8,128], index: 1, kind: input, shape index: {}]   ;;  %s647_s2 = inlined_call_operand.hbm [shape: f32[1,8,128], index: 2, kind: output, shape index: {}]  }
   0x1   :  { %8 = vsyncpa [#allocation3], 0  ;;  %s14_s11 = sshll.u32 %s645_s0, 4  ;;  %s15_s11 = int_to_ptr.vmem [resolvable:$true] %s14_s11 }
   0x2   :  { %s360_s12 = scalar_lea.vmem %s15_s11, 256  ;;  %p365_p1 = scmp.lt.s32.totalorder %s15_s11, %s15_s11 }
   0x3   :  { %p361_p0 = scmp.ne.s32.totalorder %s15_s11, %s360_s12  ;;  %p366_p2 = scmp.lt.s32.totalorder %s360_s12, %s360_s12 }
   0x5   :  { %p367_p3 = por %p366_p2, %p365_p1 }
   0x7   :  { %p368_p4 = pnand %p367_p3, %p361_p0 }
   0x9   :  { %371 = shalt.err (!%p368_p4)
}
   0xa   :  { %s398_s13 = smov [#allocation2]   ;;  %s399_s14 = smov 128  }
   0xb   :  { %s400_s15 = smov 8  }
   0xc   :  { %20 = dma.vmem_to_smem %s15_s11, 256, %s398_s13, [#allocation4], %s399_s14, %s399_s14, %s400_s15  }
   0xd   :  { %394 = dma.done.wait [#allocation4], 256  }
   0xe   :  { %395 = vsyncadd [#allocation4], 4294967040 }
   0xf   :  { %26 = sfence }
  0x10   :  { %s30_s16 = sld [smem:[#allocation2]]  ;;  %s290_s17 = sld [smem:[#allocation2 + $0x1]]  ;;  %v431_v0 = vld [vmem:[%s646_s1] sm:$0xff]  ;;  %v436_v1 = vld [vmem:[%s646_s1 + $0x8] sm:$0xff] }
  0x11   :  { %s420_s18 = sld [smem:[#allocation2 + $0x2]]  ;;  %s422_s0 = sld [smem:[#allocation2 + $0x3]] }
  0x12   :  { %s293_s19 = sld [smem:[#allocation2 + $0x80]]  ;;  %s294_s20 = sld [smem:[#allocation2 + $0x81]] }
  0x13   :  { %s424_s21 = sld [smem:[#allocation2 + $0x82]]  ;;  %s426_s22 = sld [smem:[#allocation2 + $0x83]] }
  0x14   :  { %s297_s27 = sld [smem:[#allocation2 + $0x100]]  ;;  %s298_s28 = sld [smem:[#allocation2 + $0x101]] }
  0x15   :  { %s438_s29 = sld [smem:[#allocation2 + $0x102]]  ;;  %s440_s30 = sld [smem:[#allocation2 + $0x103]] }
  0x16   :  { %v31_v2 = vstv %s30_s16  ;;  %v34_v3 = vstv %s290_s17  ;;  %s442_s3 = sld [smem:[#allocation2 + $0x180]]  ;;  %s444_s4 = sld [smem:[#allocation2 + $0x181]] }
  0x17   :  { %v32_v4 = vmul.f32 %v31_v2, %v431_v0  ;;  %v35_v5 = vmul.f32 %v436_v1, %v34_v3  ;;  %s448_s1 = sld [smem:[#allocation2 + $0x182]]  ;;  %s450_s5 = sld [smem:[#allocation2 + $0x183]]  ;;  %v38_v6 = vstv %s420_s18  ;;  %v42_v12 = vstv %s422_s0 }
  0x18   :  { %v45_v7 = vstv %s293_s19  ;;  %v48_v8 = vstv %s294_s20  ;;  %s453_s6 = sld [smem:[#allocation2 + $0x200]]  ;;  %s455_s7 = sld [smem:[#allocation2 + $0x201]] }
  0x19   :  { %v36_v9 = vadd.f32 %v35_v5, %v32_v4  ;;  %v46_v10 = vmul.f32 %v45_v7, %v431_v0  ;;  %v49_v11 = vmul.f32 %v436_v1, %v48_v8  ;;  %s459_s8 = sld [smem:[#allocation2 + $0x202]]  ;;  %s461_s9 = sld [smem:[#allocation2 + $0x203]]  ;;  %v52_v13 = vstv %s424_s21 }
  0x1a   :  { %v60_v14 = vstv %s297_s27  ;;  %v63_v15 = vstv %s298_s28  ;;  %s465_s10 = sld [smem:[#allocation2 + $0x280]]  ;;  %s467_s11 = sld [smem:[#allocation2 + $0x281]]  ;;  %v56_v20 = vstv %s426_s22 }
  0x1b   :  { %v39_v16 = vadd.f32 %v38_v6, %v36_v9  ;;  %v50_v17 = vadd.f32 %v49_v11, %v46_v10  ;;  %v61_v18 = vmul.f32 %v60_v14, %v431_v0  ;;  %v64_v19 = vmul.f32 %v436_v1, %v63_v15  ;;  %s471_s12 = sld [smem:[#allocation2 + $0x282]]  ;;  %s477_s13 = sld [smem:[#allocation2 + $0x300]] }
  0x1c   :  { %v67_v21 = vstv %s438_s29  ;;  %v75_v22 = vstv %s442_s3  ;;  %v78_v23 = vstv %s444_s4  ;;  %s479_s14 = sld [smem:[#allocation2 + $0x301]]  ;;  %v71_v28 = vstv %s440_s30  ;;  %s486_s15 = sld [smem:[#allocation2 + $0x283]] }
  0x1d   :  { %v40_v24 = vmax.f32 %v39_v16, 0.0  ;;  %v53_v25 = vadd.f32 %v52_v13, %v50_v17  ;;  %v65_v26 = vadd.f32 %v64_v19, %v61_v18  ;;  %v76_v27 = vmul.f32 %v75_v22, %v431_v0  ;;  %s488_s16 = sld [smem:[#allocation2 + $0x302]]  ;;  %s491_s17 = sld [smem:[#allocation2 + $0x380]] }
  0x1e   :  { %v79_v29 = vmul.f32 %v436_v1, %v78_v23  ;;  %v82_v30 = vstv %s448_s1  ;;  %v90_v31 = vstv %s453_s6  ;;  %s493_s18 = sld [smem:[#allocation2 + $0x381]]  ;;  %v86_v37 = vstv %s450_s5  ;;  %s500_s0 = sld [smem:[#allocation2 + $0x303]] }
  0x1f   :  { %v43_v32 = vmul.f32 %v42_v12, %v40_v24  ;;  %v54_v33 = vmax.f32 %v53_v25, 0.0  ;;  %v68_v34 = vadd.f32 %v67_v21, %v65_v26  ;;  %v91_v35 = vmul.f32 %v90_v31, %v431_v0  ;;  %s502_s19 = sld [smem:[#allocation2 + $0x382]]  ;;  %s507_s20 = sld [smem:[#allocation2 + $0x400]] }
  0x20   :  { %v80_v36 = vadd.f32 %v79_v29, %v76_v27  ;;  %v93_v38 = vstv %s455_s7  ;;  %v97_v39 = vstv %s459_s8  ;;  %v105_v43 = vstv %s465_s10  ;;  %s509_s21 = sld [smem:[#allocation2 + $0x401]]  ;;  %s515_s22 = sld [smem:[#allocation2 + $0x383]] }
  0x21   :  { %v57_v40 = vmul.f32 %v56_v20, %v54_v33  ;;  %v69_v41 = vmax.f32 %v68_v34, 0.0  ;;  %v94_v42 = vmul.f32 %v436_v1, %v93_v38  ;;  %v101_v45 = vstv %s461_s9  ;;  %s517_s23 = sld [smem:[#allocation2 + $0x402]]  ;;  %s520_s24 = sld [smem:[#allocation2 + $0x480]] }
  0x22   :  { %v83_v44 = vadd.f32 %v82_v30, %v80_v36  ;;  %v106_v46 = vmul.f32 %v105_v43, %v431_v0  ;;  %v108_v47 = vstv %s467_s11  ;;  %v112_v53 = vstv %s471_s12  ;;  %s522_s25 = sld [smem:[#allocation2 + $0x481]]  ;;  %s527_s26 = sld [smem:[#allocation2 + $0x403]] }
  0x23   :  { %v58_v48 = vadd.f32 %v57_v40, %v43_v32  ;;  %v72_v49 = vmul.f32 %v71_v28, %v69_v41  ;;  %v95_v50 = vadd.f32 %v94_v42, %v91_v35  ;;  %v109_v51 = vmul.f32 %v436_v1, %v108_v47  ;;  %s531_s27 = sld [smem:[#allocation2 + $0x482]]  ;;  %s533_s28 = sld [smem:[#allocation2 + $0x500]] }
  0x24   :  { %v84_v52 = vmax.f32 %v83_v44, 0.0  ;;  %v120_v54 = vstv %s477_s13  ;;  %v123_v55 = vstv %s479_s14  ;;  %v116_v61 = vstv %s486_s15  ;;  %s539_s29 = sld [smem:[#allocation2 + $0x483]]  ;;  %s541_s30 = sld [smem:[#allocation2 + $0x501]] }
  0x25   :  { %v73_v56 = vadd.f32 %v72_v49, %v58_v48  ;;  %v98_v57 = vadd.f32 %v97_v39, %v95_v50  ;;  %v110_v58 = vadd.f32 %v109_v51, %v106_v46  ;;  %v121_v59 = vmul.f32 %v120_v54, %v431_v0  ;;  %s545_s3 = sld [smem:[#allocation2 + $0x580]]  ;;  %s549_s4 = sld [smem:[#allocation2 + $0x502]] }
  0x26   :  { %v87_v60 = vmul.f32 %v86_v37, %v84_v52  ;;  %v124_v62 = vmul.f32 %v436_v1, %v123_v55  ;;  %v127_v63 = vstv %s488_s16  ;;  %v135_v4 = vstv %s491_s17  ;;  %s551_s1 = sld [smem:[#allocation2 + $0x581]]  ;;  %s555_s5 = sld [smem:[#allocation2 + $0x503]] }
  0x27   :  { %v99_v2 = vmax.f32 %v98_v57, 0.0  ;;  %v113_v3 = vadd.f32 %v112_v53, %v110_v58  ;;  %v138_v5 = vstv %s493_s18  ;;  %v136_v8 = vmul.f32 %v135_v4, %v431_v0  ;;  %s557_s6 = sld [smem:[#allocation2 + $0x582]]  ;;  %s561_s7 = sld [smem:[#allocation2 + $0x600]] }
  0x28   :  { %v88_v6 = vadd.f32 %v87_v60, %v73_v56  ;;  %v125_v7 = vadd.f32 %v124_v62, %v121_v59  ;;  %v139_v9 = vmul.f32 %v436_v1, %v138_v5  ;;  %v131_v12 = vstv %s500_s0  ;;  %s563_s8 = sld [smem:[#allocation2 + $0x601]]  ;;  %s567_s9 = sld [smem:[#allocation2 + $0x602]] }
  0x29   :  { %v102_v10 = vmul.f32 %v101_v45, %v99_v2  ;;  %v114_v11 = vmax.f32 %v113_v3, 0.0  ;;  %v142_v13 = vstv %s502_s19  ;;  %v150_v16 = vstv %s507_s20  ;;  %s572_s10 = sld [smem:[#allocation2 + $0x680]]  ;;  %s574_s11 = sld [smem:[#allocation2 + $0x681]] }
  0x2a   :  { %v128_v14 = vadd.f32 %v127_v63, %v125_v7  ;;  %v140_v15 = vadd.f32 %v139_v9, %v136_v8  ;;  %v153_v17 = vstv %s509_s21  ;;  %v151_v20 = vmul.f32 %v150_v16, %v431_v0  ;;  %s579_s12 = sld [smem:[#allocation2 + $0x583]]  ;;  %s581_s13 = sld [smem:[#allocation2 + $0x682]] }
  0x2b   :  { %v103_v18 = vadd.f32 %v102_v10, %v88_v6  ;;  %v117_v19 = vmul.f32 %v116_v61, %v114_v11  ;;  %v154_v21 = vmul.f32 %v436_v1, %v153_v17  ;;  %v146_v24 = vstv %s515_s22  ;;  %s585_s14 = sld [smem:[#allocation2 + $0x700]]  ;;  %s587_s15 = sld [smem:[#allocation2 + $0x701]] }
  0x2c   :  { %v129_v22 = vmax.f32 %v128_v14, 0.0  ;;  %v143_v23 = vadd.f32 %v142_v13, %v140_v15  ;;  %v157_v25 = vstv %s517_s23  ;;  %v165_v28 = vstv %s520_s24  ;;  %s594_s16 = sld [smem:[#allocation2 + $0x603]]  ;;  %s596_s17 = sld [smem:[#allocation2 + $0x702]] }
  0x2d   :  { %v118_v26 = vadd.f32 %v117_v19, %v103_v18  ;;  %v155_v27 = vadd.f32 %v154_v21, %v151_v20  ;;  %v168_v29 = vstv %s522_s25  ;;  %v166_v32 = vmul.f32 %v165_v28, %v431_v0  ;;  %s601_s18 = sld [smem:[#allocation2 + $0x780]]  ;;  %s604_s0 = sld [smem:[#allocation2 + $0x683]] }
  0x2e   :  { %v132_v30 = vmul.f32 %v131_v12, %v129_v22  ;;  %v144_v31 = vmax.f32 %v143_v23, 0.0  ;;  %v169_v33 = vmul.f32 %v436_v1, %v168_v29  ;;  %v161_v35 = vstv %s527_s26  ;;  %s606_s19 = sld [smem:[#allocation2 + $0x781]]  ;;  %s613_s20 = sld [smem:[#allocation2 + $0x703]] }
  0x2f   :  { %v158_v34 = vadd.f32 %v157_v25, %v155_v27  ;;  %v172_v36 = vstv %s531_s27  ;;  %v180_v37 = vstv %s533_s28  ;;  %v176_v43 = vstv %s539_s29  ;;  %s615_s21 = sld [smem:[#allocation2 + $0x782]]  ;;  %s352_s22 = sld [smem:[#allocation2 + $0x783]] }
  0x30   :  { %v133_v38 = vadd.f32 %v132_v30, %v118_v26  ;;  %v147_v39 = vmul.f32 %v146_v24, %v144_v31  ;;  %v170_v40 = vadd.f32 %v169_v33, %v166_v32  ;;  %v181_v41 = vmul.f32 %v180_v37, %v431_v0  ;;  %s353_s23 = sld [smem:[#allocation2 + $0x4]]  ;;  %s401_s24 = smov [#allocation5]  }
  0x31   :  { %v159_v42 = vmax.f32 %v158_v34, 0.0  ;;  %v183_v44 = vstv %s541_s30  ;;  %v195_v48 = vstv %s545_s3  ;;  %v187_v50 = vstv %s549_s4  ;;  %s280_s25 = sshll.u32 %s401_s24, 4  ;;  %s281_s25 = int_to_ptr.vmem [resolvable:$true] %s280_s25 }
  0x32   :  { %v148_v45 = vadd.f32 %v147_v39, %v133_v38  ;;  %v173_v46 = vadd.f32 %v172_v36, %v170_v40  ;;  %v184_v47 = vmul.f32 %v436_v1, %v183_v44  ;;  %v196_v51 = vmul.f32 %v195_v48, %v431_v0  ;;  %s372_s26 = scalar_lea.vmem %s281_s25, 128  ;;  %p377_p6 = scmp.lt.s32.totalorder %s281_s25, %s281_s25 }
  0x33   :  { %v162_v49 = vmul.f32 %v161_v35, %v159_v42  ;;  %v198_v52 = vstv %s551_s1  ;;  %v191_v55 = vstv %s555_s5  ;;  %v202_v58 = vstv %s557_s6  ;;  %p373_p5 = scmp.ne.s32.totalorder %s281_s25, %s372_s26  ;;  %p378_p7 = scmp.lt.s32.totalorder %s372_s26, %s372_s26 }
  0x34   :  { %v174_v53 = vmax.f32 %v173_v46, 0.0  ;;  %v185_v54 = vadd.f32 %v184_v47, %v181_v41  ;;  %v199_v56 = vmul.f32 %v436_v1, %v198_v52  ;;  %v210_v59 = vstv %s561_s7 }
  0x35   :  { %v163_v57 = vadd.f32 %v162_v49, %v148_v45  ;;  %v213_v60 = vstv %s563_s8  ;;  %v211_v2 = vmul.f32 %v210_v59, %v431_v0  ;;  %v217_v4 = vstv %s567_s9  ;;  %p379_p8 = por %p378_p7, %p377_p6 }
  0x36   :  { %v177_v61 = vmul.f32 %v176_v43, %v174_v53  ;;  %v188_v62 = vadd.f32 %v187_v50, %v185_v54  ;;  %v200_v63 = vadd.f32 %v199_v56, %v196_v51  ;;  %v214_v3 = vmul.f32 %v436_v1, %v213_v60 }
  0x37   :  { %v225_v5 = vstv %s572_s10  ;;  %v228_v6 = vstv %s574_s11  ;;  %v206_v11 = vstv %s579_s12  ;;  %v232_v14 = vstv %s581_s13  ;;  %p380_p9 = pnand %p379_p8, %p373_p5 }
  0x38   :  { %v178_v7 = vadd.f32 %v177_v61, %v163_v57  ;;  %v189_v8 = vmax.f32 %v188_v62, 0.0  ;;  %v203_v9 = vadd.f32 %v202_v58, %v200_v63  ;;  %v226_v10 = vmul.f32 %v225_v5, %v431_v0 }
  0x39   :  { %v215_v12 = vadd.f32 %v214_v3, %v211_v2  ;;  %v229_v13 = vmul.f32 %v436_v1, %v228_v6  ;;  %v240_v17 = vstv %s585_s14  ;;  %v243_v18 = vstv %s587_s15 }
  0x3a   :  { %v192_v15 = vmul.f32 %v191_v55, %v189_v8  ;;  %v204_v16 = vmax.f32 %v203_v9, 0.0  ;;  %v241_v21 = vmul.f32 %v240_v17, %v431_v0  ;;  %v244_v22 = vmul.f32 %v436_v1, %v243_v18 }
  0x3b   :  { %v218_v19 = vadd.f32 %v217_v4, %v215_v12  ;;  %v230_v20 = vadd.f32 %v229_v13, %v226_v10  ;;  %v221_v25 = vstv %s594_s16  ;;  %v247_v26 = vstv %s596_s17 }
  0x3c   :  { %v193_v23 = vadd.f32 %v192_v15, %v178_v7  ;;  %v207_v24 = vmul.f32 %v206_v11, %v204_v16  ;;  %v245_v29 = vadd.f32 %v244_v22, %v241_v21  ;;  %v255_v30 = vstv %s601_s18 }
  0x3d   :  { %v219_v27 = vmax.f32 %v218_v19, 0.0  ;;  %v233_v28 = vadd.f32 %v232_v14, %v230_v20  ;;  %v236_v32 = vstv %s604_s0  ;;  %v256_v33 = vmul.f32 %v255_v30, %v431_v0 }
  0x3e   :  { %v208_v31 = vadd.f32 %v207_v24, %v193_v23  ;;  %v258_v34 = vstv %s606_s19  ;;  %v248_v37 = vadd.f32 %v247_v26, %v245_v29  ;;  %v251_v39 = vstv %s613_s20 }
  0x3f   :  { %v222_v35 = vmul.f32 %v221_v25, %v219_v27  ;;  %v234_v36 = vmax.f32 %v233_v28, 0.0  ;;  %v259_v38 = vmul.f32 %v436_v1, %v258_v34  ;;  %v262_v40 = vstv %s615_s21 }
  0x40   :  { %v249_v43 = vmax.f32 %v248_v37, 0.0  ;;  %v266_v48 = vstv %s352_s22  ;;  %v270_v51 = vstv %s353_s23 }
  0x41   :  { %v223_v41 = vadd.f32 %v222_v35, %v208_v31  ;;  %v237_v42 = vmul.f32 %v236_v32, %v234_v36  ;;  %v260_v44 = vadd.f32 %v259_v38, %v256_v33 }
  0x42   :  { %v252_v46 = vmul.f32 %v251_v39, %v249_v43 }
  0x43   :  { %v238_v45 = vadd.f32 %v237_v42, %v223_v41  ;;  %v263_v47 = vadd.f32 %v262_v40, %v260_v44 }
  0x45   :  { %v253_v49 = vadd.f32 %v252_v46, %v238_v45  ;;  %v264_v50 = vmax.f32 %v263_v47, 0.0 }
  0x47   :  { %v267_v0 = vmul.f32 %v266_v48, %v264_v50 }
  0x49   :  { %v268_v52 = vadd.f32 %v267_v0, %v253_v49 }
  0x4b   :  { %v271_v53 = vadd.f32 %v270_v51, %v268_v52 }
  0x4d   :  { %358 = vtanh.f32 %v271_v53 }
  0x57   :  { %v359_v1 = vpop.eup %358 }
  0x58   :  { %273 = vst [vmem:[#allocation5] sm:$0xff] %v359_v1 }
  0x59   :  { %383 = shalt.err (!%p380_p9)
}
  0x5a   :  { %s384_s29 = scalar_lea.hbm %s647_s2, 128 }
  0x5b   :  { %p385_p10 = scmp.ne.s32.totalorder %s647_s2, %s384_s29  ;;  %p388_p11 = scmp.lt.u32.totalorder %s384_s29, %s647_s2 }
  0x5d   :  { %p390_p12 = pnand %p388_p11, %p385_p10 }
  0x5f   :  { %393 = shalt.err (!%p390_p12)
}
  0x60   :  { %283 = dma.vmem_to_hbm [thread:$0]  %s281_s25, 128, %s647_s2, [#allocation3]  }
  0x61   :  { %396 = dma.done.wait [#allocation3], 128  }
  0x62   :  { %397 = vsyncadd [#allocation3], 4294967168 }
  0x63   :  { %287 = vsyncpa [#allocation3], 1 }
  0x64   :  { %288 = vsyncpa [#allocation4], 1 }

</bundles_post_ra>
